<compile_context>
chip_gen: v7x
topology: tpu7x:2x2x1
jax: 0.10.0
libtpu: 0.0.40
codegen_flags: <defaults>
</compile_context>

<pallas_src>
import functools

import numpy as np

import jax
import jax.numpy as jnp
from jax import lax
from jax.experimental import pallas as pl
from jax.experimental.pallas import tpu as pltpu


# ----------------------------------------------------------------------------
# Weight-matrix construction (wrapper-side glue, PIL-BILINEAR semantics).
# ----------------------------------------------------------------------------
def _pil_bilinear_weight_matrix(in_size: int, out_size: int) -> np.ndarray:
    """(out_size, in_size) separable PIL BILINEAR resample weights.

    Mirrors PIL's precompute_coeffs: triangle filter, support scaled by the
    downscale factor (antialiased on downscale, plain bilinear on upscale),
    rows normalized to sum to 1.
    """
    w = np.zeros((out_size, in_size), dtype=np.float32)
    if out_size <= 0 or in_size <= 0:
        return w
    scale = in_size / out_size
    filterscale = max(scale, 1.0)
    support = 1.0 * filterscale  # triangle filter support == 1
    for i in range(out_size):
        center = (i + 0.5) * scale
        xmin = max(int(center - support + 0.5), 0)
        xmax = min(int(center + support + 0.5), in_size)
        xs = np.arange(xmin, xmax, dtype=np.float64)
        k = 1.0 - np.abs((xs + 0.5 - center) / filterscale)
        k = np.clip(k, 0.0, None)
        s = k.sum()
        if s > 0.0:
            k = k / s
        w[i, xmin:xmax] = k.astype(np.float32)
    return w


def _vmem_capacity_bytes() -> int:
    """Physical VMEM of the local TPU generation (fallback: 128 MiB)."""
    try:
        info = pltpu.get_tpu_info()
        cap = getattr(info, "vmem_capacity_bytes", None)
        if cap:
            return int(cap)
    except Exception:
        pass
    return 128 << 20


def _pick_plane_block(nc: int, per_plane_bytes: int, budget_bytes: int,
                      want_two_steps: bool) -> int:
    """Largest plane-batch Bp dividing NC whose resident footprint fits the
    budget.  On 2-TC (v7x-like) parts also keep >= 2 grid steps so the second
    TensorCore has work; on single-TC parts take the biggest block that fits."""
    for bp in range(nc, 0, -1):
        if nc % bp:
            continue
        if want_two_steps and nc >= 2 and nc // bp < 2:
            continue
        if bp * per_plane_bytes > budget_bytes:
            continue
        return bp
    return 1


# ----------------------------------------------------------------------------
# Kernel.
# ----------------------------------------------------------------------------
def _resize_kernel(wh_ref, wwt_ref, x_ref, o_ref, *, row_first: bool):
    # wh_ref : (Ho, H)       row-interpolation weights
    # wwt_ref: (W, Wo)       column-interpolation weights (transposed)
    # x_ref  : (Bp, H, W)    Bp image planes
    # o_ref  : (Bp, Ho, Wo)
    bp = x_ref.shape[0]
    ho, h = wh_ref.shape
    w, wo = wwt_ref.shape
    cdt = wh_ref.dtype
    bdims = ((0,), (0,))

    # Single cast on load (no-op for f32 inputs on the f32 path).
    x = x_ref[...].astype(cdt)                                    # (Bp, H, W)
    # Broadcast weights over the plane batch; both passes are one batched
    # MXU dot_general each (no per-plane loop, no reshapes/relayouts).
    wh_b = jnp.broadcast_to(wh_ref[...], (bp, ho, h))             # (Bp, Ho, H)
    wwt_b = jnp.broadcast_to(wwt_ref[...], (bp, w, wo))           # (Bp, W, Wo)

    if row_first:
        t = lax.dot_general(wh_b, x, (((2,), (1,)), bdims),
                            preferred_element_type=jnp.float32)   # (Bp, Ho, W)
        t = t.astype(cdt)
        y = lax.dot_general(t, wwt_b, (((2,), (1,)), bdims),
                            preferred_element_type=jnp.float32)   # (Bp, Ho, Wo)
    else:
        t = lax.dot_general(x, wwt_b, (((2,), (1,)), bdims),
                            preferred_element_type=jnp.float32)   # (Bp, H, Wo)
        t = t.astype(cdt)
        y = lax.dot_general(wh_b, t, (((2,), (1,)), bdims),
                            preferred_element_type=jnp.float32)   # (Bp, Ho, Wo)

    if jnp.issubdtype(o_ref.dtype, jnp.integer):
        info = jnp.iinfo(o_ref.dtype)
        y = jnp.clip(jnp.rint(y), float(info.min), float(info.max))
    o_ref[...] = y.astype(o_ref.dtype)


# ----------------------------------------------------------------------------
# Wrapper.
# ----------------------------------------------------------------------------
def adaptive_resize(x: jnp.ndarray, ratio: float) -> jnp.ndarray:
    """Pallas implementation of AdaptiveResize.forward for NCHW tensors."""
    N, C, H, W = x.shape
    # Matches forward(): size = (int(H * ratio), int(W * ratio)).
    Ho, Wo = int(H * ratio), int(W * ratio)
    NC = N * C
    if NC == 0 or Ho == 0 or Wo == 0:
        return jnp.zeros((N, C, Ho, Wo), dtype=x.dtype)

    # bf16 compute for integer / bf16 inputs (native MXU path, f32 accum);
    # f32 compute for float inputs.
    is_int = jnp.issubdtype(x.dtype, jnp.integer)
    compute_dtype = jnp.bfloat16 if (is_int or x.dtype == jnp.bfloat16) else jnp.float32
    c_item = jnp.dtype(compute_dtype).itemsize
    in_item = jnp.dtype(x.dtype).itemsize
    out_item = in_item

    wh = jnp.asarray(_pil_bilinear_weight_matrix(H, Ho), dtype=compute_dtype)    # (Ho, H)
    wwt = jnp.asarray(np.ascontiguousarray(_pil_bilinear_weight_matrix(W, Wo).T),
                      dtype=compute_dtype)                                       # (W, Wo)

    # Pass ordering: run whichever pass shrinks the intermediate more first.
    row_first = (Ho * W) <= (H * Wo)
    inter_elems = (Ho * W) if row_first else (H * Wo)

    # Generation-aware VMEM budget over ALL resident buffers.
    vmem_cap = _vmem_capacity_bytes()
    per_plane = (
        2 * H * W * in_item                 # double-buffered input block
        + 2 * Ho * Wo * out_item            # double-buffered output block
        + (H * W * c_item if jnp.dtype(x.dtype) != jnp.dtype(compute_dtype) else 0)
        + (Ho * H + W * Wo) * c_item        # broadcast weights (per plane)
        + inter_elems * (4 + c_item)        # first-pass f32 accum + cast
        + Ho * Wo * 4                       # second-pass f32 accum
    )
    fixed_bytes = 2 * (Ho * H + W * Wo) * c_item + (2 << 20)
    budget = max(int(0.70 * vmem_cap) - fixed_bytes, per_plane)
    want_two_steps = vmem_cap <= (96 << 20)   # v7x-like (2 TCs, 64 MiB VMEM)
    Bp = _pick_plane_block(NC, per_plane, budget, want_two_steps)
    grid = (NC // Bp,)

    vmem_need = Bp * per_plane + fixed_bytes
    vmem_limit = int(min(int(0.95 * vmem_cap), max(vmem_need + (4 << 20), 32 << 20)))

    if row_first:
        flops = 2 * NC * (Ho * H * W + Ho * W * Wo)
    else:
        flops = 2 * NC * (H * W * Wo + Ho * H * Wo)
    bytes_accessed = (NC * H * W * in_item
                      + NC * Ho * Wo * out_item
                      + NC * inter_elems * c_item
                      + (wh.size + wwt.size) * c_item)

    kernel = functools.partial(_resize_kernel, row_first=row_first)
    out = pl.pallas_call(
        kernel,
        out_shape=jax.ShapeDtypeStruct((NC, Ho, Wo), x.dtype),
        grid=grid,
        in_specs=[
            pl.BlockSpec((Ho, H), lambda b: (0, 0)),
            pl.BlockSpec((W, Wo), lambda b: (0, 0)),
            pl.BlockSpec((Bp, H, W), lambda b: (b, 0, 0)),
        ],
        out_specs=pl.BlockSpec((Bp, Ho, Wo), lambda b: (b, 0, 0)),
        compiler_params=pltpu.CompilerParams(
            dimension_semantics=("parallel",),
            vmem_limit_bytes=vmem_limit,
        ),
        cost_estimate=pl.CostEstimate(
            flops=int(flops), transcendentals=0, bytes_accessed=int(bytes_accessed)),
    )(wh, wwt, x.reshape(NC, H, W))

    return out.reshape(N, C, Ho, Wo)


# ----------------------------------------------------------------------------
# Pure-JAX reference (same separable math) for the sanity check.
# ----------------------------------------------------------------------------
def _reference_resize(x: jnp.ndarray, ratio: float) -> jnp.ndarray:
    N, C, H, W = x.shape
    Ho, Wo = int(H * ratio), int(W * ratio)
    wh = jnp.asarray(_pil_bilinear_weight_matrix(H, Ho))
    ww = jnp.asarray(_pil_bilinear_weight_matrix(W, Wo))
    y = jnp.einsum('oh,nchw,pw->ncop', wh, x.astype(jnp.float32), ww)
    return y.astype(x.dtype)


if __name__ == "__main__":
    key = jax.random.PRNGKey(0)
    N, C, H, W = 2, 4, 16, 16
    ratio = 0.5
    x = jax.random.uniform(key, (N, C, H, W), dtype=jnp.float32)

    y = adaptive_resize(x, ratio)
    jax.block_until_ready(y)

    y_ref = _reference_resize(x, ratio)
    assert y.shape == (N, C, int(H * ratio), int(W * ratio)), y.shape
    assert jnp.allclose(y, y_ref, atol=1e-5, rtol=1e-5), \
        float(jnp.max(jnp.abs(y - y_ref)))

    print("KERNEL_OK")
</pallas_src>

<mosaic_0001>
module attributes {stable_mosaic.version = 11 : i64} {
  func.func @_resize_kernel(%arg0: i32, %arg1: memref<8x16xf32, #tpu.memory_space<vmem>>, %arg2: memref<16x8xf32, #tpu.memory_space<vmem>>, %arg3: memref<8x16x16xf32, #tpu.memory_space<vmem>>, %arg4: memref<8x8x8xf32, #tpu.memory_space<vmem>>) attributes {dimension_semantics = [#tpu.dimension_semantics<parallel>], iteration_bounds = array<i64: 1>, scalar_prefetch = 0 : i64, scratch_operands = 0 : i64, tpu.core_type = #tpu.core_type<tc>, window_params = [{pipeline_mode = #tpu.pipeline_mode<synchronous>, transform_indices = @transform_0, window_bounds = array<i64: 8, 16>}, {pipeline_mode = #tpu.pipeline_mode<synchronous>, transform_indices = @transform_1, window_bounds = array<i64: 16, 8>}, {transform_indices = @transform_2, window_bounds = array<i64: 8, 16, 16>}, {transform_indices = @transform_3, window_bounds = array<i64: 8, 8, 8>}]} {
    %c0 = arith.constant 0 : index
    %c0_0 = arith.constant 0 : index
    %c0_1 = arith.constant 0 : index
    %0 = vector.load %arg3[%c0, %c0_0, %c0_1] : memref<8x16x16xf32, #tpu.memory_space<vmem>>, vector<8x16x16xf32>
    %c0_2 = arith.constant 0 : index
    %c0_3 = arith.constant 0 : index
    %1 = vector.load %arg1[%c0_2, %c0_3] : memref<8x16xf32, #tpu.memory_space<vmem>>, vector<8x16xf32>
    %2 = vector.shape_cast %1 : vector<8x16xf32> to vector<1x8x16xf32>
    %3 = vector.broadcast %2 : vector<1x8x16xf32> to vector<8x8x16xf32>
    %c0_4 = arith.constant 0 : index
    %c0_5 = arith.constant 0 : index
    %4 = vector.load %arg2[%c0_4, %c0_5] : memref<16x8xf32, #tpu.memory_space<vmem>>, vector<16x8xf32>
    %5 = vector.shape_cast %4 : vector<16x8xf32> to vector<1x16x8xf32>
    %6 = vector.broadcast %5 : vector<1x16x8xf32> to vector<8x16x8xf32>
    %cst = arith.constant dense<0.000000e+00> : vector<8x8x16xf32>
    %7 = tpu.matmul %3, %0, %cst {dimension_numbers = #tpu.dot_dimension_numbers<[2], [1], [1], [2], [0, 0, 0, 1, 1, 2], [0], [0]>} : vector<8x8x16xf32>, vector<8x16x16xf32>, vector<8x8x16xf32> -> vector<8x8x16xf32>
    %cst_6 = arith.constant dense<0.000000e+00> : vector<8x8x8xf32>
    %8 = tpu.matmul %7, %6, %cst_6 {dimension_numbers = #tpu.dot_dimension_numbers<[2], [1], [1], [2], [0, 0, 0, 1, 1, 2], [0], [0]>} : vector<8x8x16xf32>, vector<8x16x8xf32>, vector<8x8x8xf32> -> vector<8x8x8xf32>
    %c0_7 = arith.constant 0 : index
    %c0_8 = arith.constant 0 : index
    %c0_9 = arith.constant 0 : index
    %9 = vector.load %arg4[%c0_7, %c0_8, %c0_9] : memref<8x8x8xf32, #tpu.memory_space<vmem>>, vector<8x8x8xf32>
    tpu.vector_store %arg4[%c0_7, %c0_8, %c0_9], %8 {strides = array<i32>} : memref<8x8x8xf32, #tpu.memory_space<vmem>>, vector<8x8x8xf32>,
    return
  }
  func.func @transform_0(%arg0: i32) -> (i32, i32) {
    %c0_i32 = arith.constant 0 : i32
    %c0_i32_0 = arith.constant 0 : i32
    %c0_i32_1 = arith.constant 0 : i32
    return %c0_i32, %c0_i32_0 : i32, i32
  }
  func.func @transform_1(%arg0: i32) -> (i32, i32) {
    %c0_i32 = arith.constant 0 : i32
    %c0_i32_0 = arith.constant 0 : i32
    %c0_i32_1 = arith.constant 0 : i32
    return %c0_i32, %c0_i32_0 : i32, i32
  }
  func.func @transform_2(%arg0: i32) -> (i32, i32, i32) {
    %c0_i32 = arith.constant 0 : i32
    %c0_i32_0 = arith.constant 0 : i32
    %c0_i32_1 = arith.constant 0 : i32
    return %arg0, %c0_i32, %c0_i32_0 : i32, i32, i32
  }
  func.func @transform_3(%arg0: i32) -> (i32, i32, i32) {
    %c0_i32 = arith.constant 0 : i32
    %c0_i32_0 = arith.constant 0 : i32
    %c0_i32_1 = arith.constant 0 : i32
    return %arg0, %c0_i32, %c0_i32_0 : i32, i32, i32
  }
}

</mosaic_0001>

<bundles_post_ra>
// kernel: tpu_custom_call.1
= control target key start
LH: loop header
LB: loop body
LE: loop exit
PB: predicated region body
PF: predicated region fallthrough
CT: control target
= control target key end

     0   :  { %8 = vsyncpa [#allocation3], 0  ;;  %s1639_s0 = inlined_call_operand.vmem [shape: f32[8,16], index: 0, kind: input, shape index: {}]   ;;  %s1640_s1 = inlined_call_operand.vmem [shape: f32[16,8], index: 1, kind: input, shape index: {}]   ;;  %s1641_s2 = inlined_call_operand.hbm [shape: f32[8,16,16], index: 2, kind: input, shape index: {}]   ;;  %s1642_s3 = inlined_call_operand.hbm [shape: f32[8,8,8], index: 3, kind: output, shape index: {}]  }
   0x1   :  { %9 = vsyncpa [#allocation4], 0  ;;  %s1501_s12 = smov [#allocation2]   ;;  %s1453_s16 = scalar_lea.hbm %s1641_s2, 2048 }
   0x2   :  { %s19_s13 = sshll.u32 %s1501_s12, 4  ;;  %p1454_p0 = scmp.ne.s32.totalorder %s1641_s2, %s1453_s16  ;;  %s20_s13 = int_to_ptr.vmem [resolvable:$true] %s19_s13 }
   0x3   :  { %p1457_p1 = scmp.lt.u32.totalorder %s1453_s16, %s1641_s2 }
   0x5   :  { %p1459_p2 = pnand %p1457_p1, %p1454_p0 }
   0x7   :  { %1462 = shalt.err (!%p1459_p2)
}
   0x8   :  { %s1463_s21 = scalar_lea.vmem %s20_s13, 2048  ;;  %p1468_p4 = scmp.lt.s32.totalorder %s20_s13, %s20_s13 }
   0x9   :  { %p1464_p3 = scmp.ne.s32.totalorder %s20_s13, %s1463_s21  ;;  %p1469_p5 = scmp.lt.s32.totalorder %s1463_s21, %s1463_s21 }
   0xb   :  { %p1470_p6 = por %p1469_p5, %p1468_p4 }
   0xd   :  { %p1471_p7 = pnand %p1470_p6, %p1464_p3 }
   0xf   :  { %1474 = shalt.err (!%p1471_p7)
}
  0x10   :  { %s1502_s22 = smov 128   ;;  %s1503_s23 = smov 8  }
  0x11   :  { %25 = dma.hbm_to_vmem [thread:$0]  %s1641_s2, 2048, %s20_s13, [#allocation3], %s1502_s22, %s1502_s22, %s1503_s23  }
  0x12   :  { %1497 = dma.done.wait [#allocation3], 2048  }
  0x13   :  { %1498 = vsyncadd [#allocation3], 4294965248  ;;  %v1504_v0 = vmov 0.0|0.0   ;;  %vm1505_vm0 = vmmov 0   ;;  %v1506_v1 = vmov 0.0   ;;  %v29_v2 = vld [vmem:[#allocation2] sm:$0xff] }
  0x14   :  { %1398 = vmatprep.subr.bf16.mxu0 %v1504_v0  ;;  %1401 = vmatprep.subr.bf16.mxu1 %v1504_v0  ;;  %v30_v3 = vld [vmem:[#allocation2 + $0x8] sm:$0xff]  ;;  %v31_v4 = vld [vmem:[#allocation2 + $0x10] sm:$0xff]  ;;  %v32_v6 = vld [vmem:[#allocation2 + $0x18] sm:$0xff]  ;;  %vm48_vm1 = vcmask 130048   ;;  %vm1196_vm2 = vcmask 64512  }
  0x15   :  { %1290 = vmatprep.mubr.msk.f32.mxu0 %vm1505_vm0, %v1506_v1  ;;  %1297 = vmatprep.mubr.msk.f32.mxu1 %vm1505_vm0, %v1506_v1  ;;  %v1399_v5 = vpack.c.bf16 %v30_v3, %v29_v2  ;;  %v33_v7 = vld [vmem:[#allocation2 + $0x20] sm:$0xff]  ;;  %v1402_v8 = vpack.c.bf16 %v32_v6, %v31_v4  ;;  %v34_v9 = vld [vmem:[#allocation2 + $0x28] sm:$0xff]  ;;  %v35_v10 = vld [vmem:[#allocation2 + $0x30] sm:$0xff] }
  0x16   :  { %v36_v11 = vld [vmem:[#allocation2 + $0x38] sm:$0xff]  ;;  %v45_v12 = vld [vmem:[%s1639_s0] sm:$0xff]  ;;  %v1405_v13 = vpack.c.bf16 %v34_v9, %v33_v7  ;;  %v38_v16 = vld [vmem:[#allocation2 + $0x48] sm:$0xff] }
  0x17   :  { %1400 = vmatpush3.bf16.msra.mxu0 %v1399_v5  ;;  %1403 = vmatpush3.bf16.msra.mxu1 %v1402_v8  ;;  %v1408_v14 = vpack.c.bf16 %v36_v11, %v35_v10  ;;  %v37_v15 = vld [vmem:[#allocation2 + $0x40] sm:$0xff]  ;;  %v39_v17 = vld [vmem:[#allocation2 + $0x50] sm:$0xff]  ;;  %v40_v18 = vld [vmem:[#allocation2 + $0x58] sm:$0xff] }
  0x18   :  { %1404 = vmatprep.subr.bf16.mxu0 %v1504_v0  ;;  %1407 = vmatprep.subr.bf16.mxu1 %v1504_v0  ;;  %v1411_v19 = vpack.c.bf16 %v38_v16, %v37_v15  ;;  %v1414_v20 = vpack.c.bf16 %v40_v18, %v39_v17  ;;  %v41_v21 = vld [vmem:[#allocation2 + $0x60] sm:$0xff]  ;;  %v42_v22 = vld [vmem:[#allocation2 + $0x68] sm:$0xff]  ;;  %v43_v23 = vld [vmem:[#allocation2 + $0x70] sm:$0xff] }
  0x19   :  { %v44_v24 = vld [vmem:[#allocation2 + $0x78] sm:$0xff]  ;;  %v1417_v25 = vpack.c.bf16 %v42_v22, %v41_v21  ;;  %v46_v27 = vld [vmem:[%s1640_s1] sm:$0xff]  ;;  %v47_v28 = vld [vmem:[%s1640_s1 + $0x8] sm:$0xff]  ;;  %s1507_s1 = smov [#allocation5]  }
  0x1a   :  { %1291 = vmatmul.mubr.msk.f32.vlgmr.msra.gmra.mrb[0].mxu0 %vm48_vm1, %v45_v12  ;;  %1298 = vmatmul.mubr.msk.f32.vlgmr.msra.gmra.mrb[0].mxu1 %vm48_vm1, %v45_v12  ;;  %v1420_v26 = vpack.c.bf16 %v44_v24, %v43_v23  ;;  %v1423_v29 = vpack.c.bf16 %v47_v28, %v46_v27  ;;  %s1210_s30 = sshll.u32 %s1507_s1, 4  ;;  %s1211_s30 = int_to_ptr.vmem [resolvable:$true] %s1210_s30 }
  0x1b   :  { %1406 = vmatpush3.bf16.msra.mxu0 %v1405_v13  ;;  %1409 = vmatpush3.bf16.msra.mxu1 %v1408_v14  ;;  %s1475_s4 = scalar_lea.vmem %s1211_s30, 1024  ;;  %p1480_p9 = scmp.lt.s32.totalorder %s1211_s30, %s1211_s30 }
  0x1c   :  { %1304 = vmatprep.mubr.msk.f32.mxu0 %vm1505_vm0, %v1506_v1  ;;  %1311 = vmatprep.mubr.msk.f32.mxu1 %vm1505_vm0, %v1506_v1  ;;  %p1476_p8 = scmp.ne.s32.totalorder %s1211_s30, %s1475_s4  ;;  %p1481_p10 = scmp.lt.s32.totalorder %s1475_s4, %s1475_s4 }
  0x1d   :  { %1410 = vmatprep.subr.bf16.mxu0 %v1504_v0  ;;  %1413 = vmatprep.subr.bf16.mxu1 %v1504_v0 }
  0x1e   :  { %1305 = vmatmul.mubr.msk.f32.vlgmr.msra.gmra.mrb[2].mxu0 %vm48_vm1, %v45_v12  ;;  %1312 = vmatmul.mubr.msk.f32.vlgmr.msra.gmra.mrb[2].mxu1 %vm48_vm1, %v45_v12  ;;  %p1482_p11 = por %p1481_p10, %p1480_p9 }
  0x1f   :  { %1412 = vmatpush3.bf16.msra.mxu0 %v1411_v19  ;;  %1415 = vmatpush3.bf16.msra.mxu1 %v1414_v20 }
  0x20   :  { %1318 = vmatprep.mubr.msk.f32.mxu0 %vm1505_vm0, %v1506_v1  ;;  %1325 = vmatprep.mubr.msk.f32.mxu1 %vm1505_vm0, %v1506_v1  ;;  %p1483_p12 = pnand %p1482_p11, %p1476_p8 }
  0x21   :  { %1416 = vmatprep.subr.bf16.mxu0 %v1504_v0  ;;  %1419 = vmatprep.subr.bf16.mxu1 %v1504_v0 }
  0x22   :  { %1319 = vmatmul.mubr.msk.f32.vlgmr.msra.gmra.mrb[4].mxu0 %vm48_vm1, %v45_v12  ;;  %1326 = vmatmul.mubr.msk.f32.vlgmr.msra.gmra.mrb[4].mxu1 %vm48_vm1, %v45_v12 }
  0x23   :  { %1418 = vmatpush3.bf16.msra.mxu0 %v1417_v25  ;;  %1421 = vmatpush3.bf16.msra.mxu1 %v1420_v26 }
  0x24   :  { %1332 = vmatprep.mubr.msk.f32.mxu0 %vm1505_vm0, %v1506_v1  ;;  %1339 = vmatprep.mubr.msk.f32.mxu1 %vm1505_vm0, %v1506_v1 }
  0x25   :  { %1422 = vmatprep.subr.bf16.mxu0 %v1504_v0  ;;  %1425 = vmatprep.subr.bf16.mxu1 %v1504_v0 }
  0x26   :  { %1333 = vmatmul.mubr.msk.f32.vlgmr.msra.gmra.mrb[6].mxu0 %vm48_vm1, %v45_v12  ;;  %1340 = vmatmul.mubr.msk.f32.vlgmr.msra.gmra.mrb[6].mxu1 %vm48_vm1, %v45_v12 }
  0x27   :  { %1424 = vmatpush3.bf16.msra.mxu0 %v1423_v29  ;;  %1427 = vmatpush3.bf16.msra.mxu1 %v1423_v29 }
  0x28   :  { %1346 = vmatprep.mubr.msk.f32.mxu0 %vm1505_vm0, %v1506_v1  ;;  %1353 = vmatprep.mubr.msk.f32.mxu1 %vm1505_vm0, %v1506_v1 }
  0x29   :  { %1428 = vmatprep.subr.bf16.mxu0 %v1504_v0  ;;  %1431 = vmatprep.subr.bf16.mxu1 %v1504_v0 }
  0xed   :  { %v118_v30 = vpop.f32.mrb[0].mxu0  ;;  %v188_v31 = vpop.f32.mrb[0].mxu1 }
  0xee   :  { %v1292_v32 = vpop.f32.mrb[1].mxu0  ;;  %1347 = vmatmul.mubr.msk.f32.vlgmr.msra.gmra.mrb[8].mxu0 %vm48_vm1, %v118_v30  ;;  %v1299_v33 = vpop.f32.mrb[1].mxu1  ;;  %1354 = vmatmul.mubr.msk.f32.vlgmr.msra.gmra.mrb[8].mxu1 %vm48_vm1, %v188_v31 }
  0xef   :  { %1430 = vmatpush3.bf16.msra.mxu0 %v1423_v29  ;;  %1433 = vmatpush3.bf16.msra.mxu1 %v1423_v29 }
  0xf0   :  { %1360 = vmatprep.mubr.msk.f32.mxu0 %vm1505_vm0, %v1506_v1  ;;  %1367 = vmatprep.mubr.msk.f32.mxu1 %vm1505_vm0, %v1506_v1 }
  0xf1   :  { %v258_v34 = vpop.f32.mrb[2].mxu0  ;;  %1434 = vmatprep.subr.bf16.mxu0 %v1504_v0  ;;  %v328_v35 = vpop.f32.mrb[2].mxu1  ;;  %1437 = vmatprep.subr.bf16.mxu1 %v1504_v0 }
  0xf2   :  { %v1306_v36 = vpop.f32.mrb[3].mxu0  ;;  %1361 = vmatmul.mubr.msk.f32.vlgmr.msra.gmra.mrb[10].mxu0 %vm48_vm1, %v258_v34  ;;  %v1313_v37 = vpop.f32.mrb[3].mxu1  ;;  %1368 = vmatmul.mubr.msk.f32.vlgmr.msra.gmra.mrb[10].mxu1 %vm48_vm1, %v328_v35 }
  0xf3   :  { %1436 = vmatpush3.bf16.msra.mxu0 %v1423_v29  ;;  %1439 = vmatpush3.bf16.msra.mxu1 %v1423_v29 }
  0xf4   :  { %1374 = vmatprep.mubr.msk.f32.mxu0 %vm1505_vm0, %v1506_v1  ;;  %1381 = vmatprep.mubr.msk.f32.mxu1 %vm1505_vm0, %v1506_v1 }
  0xf5   :  { %v398_v38 = vpop.f32.mrb[4].mxu0  ;;  %1440 = vmatprep.subr.bf16.mxu0 %v1504_v0  ;;  %v468_v39 = vpop.f32.mrb[4].mxu1  ;;  %1443 = vmatprep.subr.bf16.mxu1 %v1504_v0 }
  0xf6   :  { %v1320_v40 = vpop.f32.mrb[5].mxu0  ;;  %1375 = vmatmul.mubr.msk.f32.vlgmr.msra.gmra.mrb[12].mxu0 %vm48_vm1, %v398_v38  ;;  %v1327_v41 = vpop.f32.mrb[5].mxu1  ;;  %1382 = vmatmul.mubr.msk.f32.vlgmr.msra.gmra.mrb[12].mxu1 %vm48_vm1, %v468_v39 }
  0xf7   :  { %1442 = vmatpush3.bf16.msra.mxu0 %v1423_v29  ;;  %1445 = vmatpush3.bf16.msra.mxu1 %v1423_v29 }
  0xf8   :  { %1388 = vmatprep.mubr.msk.f32.mxu0 %vm1505_vm0, %v1506_v1  ;;  %1395 = vmatprep.mubr.msk.f32.mxu1 %vm1505_vm0, %v1506_v1 }
  0xf9   :  { %v538_v42 = vpop.f32.mrb[6].mxu0  ;;  %v608_v43 = vpop.f32.mrb[6].mxu1 }
  0xfa   :  { %v1334_v44 = vpop.f32.mrb[7].mxu0  ;;  %1389 = vmatmul.mubr.msk.f32.vlgmr.msra.gmra.mrb[14].mxu0 %vm48_vm1, %v538_v42  ;;  %v1341_v45 = vpop.f32.mrb[7].mxu1  ;;  %1396 = vmatmul.mubr.msk.f32.vlgmr.msra.gmra.mrb[14].mxu1 %vm48_vm1, %v608_v43 }
 0x1c1   :  { %v681_v46 = vpop.f32.mrb[8].mxu0  ;;  %v754_v47 = vpop.f32.mrb[8].mxu1 }
 0x1c2   :  { %1197 = vst.msk [vmem:[#allocation5] sm:$0xff] %vm1196_vm2, %v681_v46  ;;  %v1348_v48 = vpop.f32.mrb[9].mxu0  ;;  %1198 = vst.msk [vmem:[#allocation5 + $0x8] sm:$0xff] %vm1196_vm2, %v754_v47  ;;  %v1355_v49 = vpop.f32.mrb[9].mxu1 }
 0x1c5   :  { %v827_v50 = vpop.f32.mrb[10].mxu0  ;;  %v900_v51 = vpop.f32.mrb[10].mxu1 }
 0x1c6   :  { %1199 = vst.msk [vmem:[#allocation5 + $0x10] sm:$0xff] %vm1196_vm2, %v827_v50  ;;  %v1362_v52 = vpop.f32.mrb[11].mxu0  ;;  %1200 = vst.msk [vmem:[#allocation5 + $0x18] sm:$0xff] %vm1196_vm2, %v900_v51  ;;  %v1369_v53 = vpop.f32.mrb[11].mxu1 }
 0x1c9   :  { %v973_v54 = vpop.f32.mrb[12].mxu0  ;;  %v1046_v55 = vpop.f32.mrb[12].mxu1 }
 0x1ca   :  { %1201 = vst.msk [vmem:[#allocation5 + $0x20] sm:$0xff] %vm1196_vm2, %v973_v54  ;;  %v1376_v56 = vpop.f32.mrb[13].mxu0  ;;  %1202 = vst.msk [vmem:[#allocation5 + $0x28] sm:$0xff] %vm1196_vm2, %v1046_v55  ;;  %v1383_v57 = vpop.f32.mrb[13].mxu1 }
 0x1cd   :  { %v1119_v58 = vpop.f32.mrb[14].mxu0  ;;  %v1192_v59 = vpop.f32.mrb[14].mxu1 }
 0x1ce   :  { %1203 = vst.msk [vmem:[#allocation5 + $0x30] sm:$0xff] %vm1196_vm2, %v1119_v58  ;;  %v1390_v60 = vpop.f32.mrb[15].mxu0  ;;  %1204 = vst.msk [vmem:[#allocation5 + $0x38] sm:$0xff] %vm1196_vm2, %v1192_v59  ;;  %v1397_v61 = vpop.f32.mrb[15].mxu1 }
 0x1cf   :  { %1486 = shalt.err (!%p1483_p12)
}
 0x1d0   :  { %s1487_s7 = scalar_lea.hbm %s1642_s3, 1024 }
 0x1d1   :  { %p1488_p13 = scmp.ne.s32.totalorder %s1642_s3, %s1487_s7  ;;  %p1491_p0 = scmp.lt.u32.totalorder %s1487_s7, %s1642_s3 }
 0x1d3   :  { %p1493_p1 = pnand %p1491_p0, %p1488_p13 }
 0x1d5   :  { %1496 = shalt.err (!%p1493_p1)
}
 0x1d6   :  { %1216 = dma.vmem_to_hbm [thread:$0]  %s1211_s30, 1024, %s1642_s3, [#allocation4], %s1502_s22, %s1502_s22, %s1503_s23  }
 0x1d7   :  { %1499 = dma.done.wait [#allocation4], 1024  }
 0x1d8   :  { %1500 = vsyncadd [#allocation4], 4294966272 }
 0x1d9   :  { %1220 = vsyncpa [#allocation3], 1 }
 0x1da   :  { %1221 = vsyncpa [#allocation4], 1 }

</bundles_post_ra>
